<compile_context>
chip_gen: v7x
topology: tpu7x:2x2x1
jax: 0.10.0
libtpu: 0.0.40
codegen_flags: <defaults>
</compile_context>

<pallas_src>
import functools

import jax
import jax.numpy as jnp
import numpy as np
from jax.experimental import pallas as pl
from jax.experimental.pallas import tpu as pltpu


def residual_block_kernel(*args, kernel_size, dilation, halo_mode):
    """One (batch, time-tile) step.  Layout: channels on sublanes, time on lanes."""
    if halo_mode == "prev_tile":
        (x_cur_ref, x_prev_ref, skp_ref, wd_ref, bd_ref, wr_ref, br_ref,
         ws_ref, bs_ref, res_out_ref, skp_out_ref) = args
        carry_ref = None
    elif halo_mode == "carry":
        (x_cur_ref, skp_ref, wd_ref, bd_ref, wr_ref, br_ref,
         ws_ref, bs_ref, res_out_ref, skp_out_ref, carry_ref) = args
        x_prev_ref = None
    else:  # "none"
        (x_cur_ref, skp_ref, wd_ref, bd_ref, wr_ref, br_ref,
         ws_ref, bs_ref, res_out_ref, skp_out_ref) = args
        x_prev_ref = None
        carry_ref = None

    pad = (kernel_size - 1) * dilation
    C = x_cur_ref.shape[1]           # res_size (sublane axis)
    Tt = x_cur_ref.shape[2]          # time-tile length (lane axis)
    j = pl.program_id(1)             # time-tile index
    mm_dtype = wd_ref.dtype          # matmul input dtype (f32 or bf16)

    x_cur = x_cur_ref[0]             # (C, Tt), f32

    prev = None
    if pad > 0:
        lane = jax.lax.broadcasted_iota(jnp.int32, (C, Tt), 1)   # lane index
        if halo_mode == "prev_tile":
            prev_src = x_prev_ref[0]                              # previous time tile
        elif halo_mode == "carry":
            prev_src = carry_ref[...]                             # carried from step j-1
        else:
            prev_src = None
        if prev_src is not None:
            # Zero the halo on the first tile of each sequence -> causal zero padding.
            prev = jnp.where(j > 0, prev_src, jnp.zeros_like(prev_src))

    # Dilated causal conv expressed as K per-tap (2C,C)@(C,Tt) matmuls on the
    # time-shifted input.  Shifts use pltpu.roll (XLU) + lane select (VPU); no
    # jnp.pad / concat / unaligned VMEM slices.  Kernel is HBM-bandwidth bound
    # at these channel counts, so the under-utilized MXU is irrelevant.
    acc = jnp.zeros((2 * C, Tt), jnp.float32)
    for k in range(kernel_size):                     # static, tiny trip count
        s = pad - k * dilation                       # how far back in time tap k reads
        if s == 0:
            xs = x_cur
        else:
            cur_rolled = pltpu.roll(x_cur, shift=s, axis=1)
            if prev is None:
                xs = jnp.where(lane < s, jnp.zeros_like(cur_rolled), cur_rolled)
            else:
                xs = jnp.where(lane < s, pltpu.roll(prev, shift=s, axis=1), cur_rolled)
        acc = acc + jnp.dot(wd_ref[k], xs.astype(mm_dtype),
                            preferred_element_type=jnp.float32)
    acc = acc + bd_ref[...]                          # (2C, 1) broadcasts over lanes

    # Gated activation: sigmoid(xa) * tanh(xb)  (kept in f32 for all chips).
    g = jax.nn.sigmoid(acc[:C, :]) * jnp.tanh(acc[C:, :])         # (C, Tt)
    g_mm = g.astype(mm_dtype)

    # res = x + rconv(g)   (1x1 conv == (C,C) @ (C,Tt) matmul)
    res = (x_cur
           + jnp.dot(wr_ref[...], g_mm, preferred_element_type=jnp.float32)
           + br_ref[...])
    # skp = skp + sconv(g)
    skp_new = (skp_ref[0]
               + jnp.dot(ws_ref[...], g_mm, preferred_element_type=jnp.float32)
               + bs_ref[...])

    res_out_ref[0] = res.astype(res_out_ref.dtype)
    skp_out_ref[0] = skp_new.astype(skp_out_ref.dtype)

    if halo_mode == "carry":
        # Save the current tile for the next (sequential) time step of this batch.
        carry_ref[...] = x_cur


def _choose_tile_t(T, pad):
    """Largest time tile that divides T, is lane-dense (mult. of 128) and >= pad."""
    if T <= 4096 or T % 128 != 0:
        return T                      # small/odd T: one tile per sequence
    for cand in (4096, 3072, 2048, 1536, 1024, 512, 384, 256, 128):
        if T % cand == 0 and cand >= pad:
            return cand
    return T


def residual_block_pallas(x, skp, params, *, kernel_size, dilation,
                          matmul_dtype=jnp.float32, tile_t=None, halo_mode=None):
    """x: (B, res_size, T), skp: (B, skp_size, T)  -- PyTorch NCL convention.

    params = (wd, bd, wr, br, ws, bs) with
      wd: (K, 2C, C) per-tap (out, in) matrices,  bd: (2C, 1)
      wr: (C, C) (out, in),  br: (C, 1),  ws: (S, C),  bs: (S, 1)
    """
    wd, bd, wr, br, ws, bs = params
    B, C, T = x.shape
    S = skp.shape[1]
    pad = (kernel_size - 1) * dilation

    if tile_t is None:
        tile_t = _choose_tile_t(T, pad)
    assert T % tile_t == 0, "tile_t must divide T"
    n_t = T // tile_t
    assert n_t == 1 or tile_t >= pad, "halo must fit in one neighbouring tile"

    if halo_mode is None:
        if pad == 0 or n_t == 1:
            halo_mode = "none"          # no halo needed at all; x read exactly once
        elif B == 1:
            halo_mode = "prev_tile"     # keep both grid axes parallel for megacore
        else:
            halo_mode = "carry"         # avoid re-reading the previous tile from HBM
    if n_t == 1 and halo_mode != "none":
        halo_mode = "none"
    assert not (halo_mode == "none" and pad > 0 and n_t > 1), \
        "halo_mode='none' is only valid for a single time tile or kernel_size==1"

    # bf16 MXU inputs on v6e/v7x; accumulation & gate stay f32. Biases stay f32.
    wd = wd.astype(matmul_dtype)
    wr = wr.astype(matmul_dtype)
    ws = ws.astype(matmul_dtype)

    kernel = functools.partial(residual_block_kernel, kernel_size=kernel_size,
                               dilation=dilation, halo_mode=halo_mode)

    x_spec = pl.BlockSpec((1, C, tile_t), lambda b, j: (b, 0, j))
    skp_spec = pl.BlockSpec((1, S, tile_t), lambda b, j: (b, 0, j))
    w_specs = [
        pl.BlockSpec(wd.shape, lambda b, j: (0, 0, 0)),   # dconv per-tap weights
        pl.BlockSpec(bd.shape, lambda b, j: (0, 0)),      # dconv bias
        pl.BlockSpec(wr.shape, lambda b, j: (0, 0)),      # rconv weight
        pl.BlockSpec(br.shape, lambda b, j: (0, 0)),      # rconv bias
        pl.BlockSpec(ws.shape, lambda b, j: (0, 0)),      # sconv weight
        pl.BlockSpec(bs.shape, lambda b, j: (0, 0)),      # sconv bias
    ]

    if halo_mode == "prev_tile":
        in_specs = [x_spec,
                    # previous time tile (halo source; clamped at j==0, kernel zeroes it)
                    pl.BlockSpec((1, C, tile_t),
                                 lambda b, j: (b, 0, jnp.maximum(j - 1, 0))),
                    skp_spec] + w_specs
        inputs = (x, x, skp, wd, bd, wr, br, ws, bs)
        skp_in_idx = 2
        scratch_shapes = []
        dim_sem = ("parallel", "parallel")
    else:
        in_specs = [x_spec, skp_spec] + w_specs
        inputs = (x, skp, wd, bd, wr, br, ws, bs)
        skp_in_idx = 1
        scratch_shapes = ([pltpu.VMEM((C, tile_t), x.dtype)]
                          if halo_mode == "carry" else [])
        # "carry" needs the time axis executed in order on one core.
        dim_sem = ("parallel", "arbitrary" if halo_mode == "carry" else "parallel")

    res, skp_out = pl.pallas_call(
        kernel,
        out_shape=(jax.ShapeDtypeStruct((B, C, T), x.dtype),
                   jax.ShapeDtypeStruct((B, S, T), skp.dtype)),
        grid_spec=pltpu.PrefetchScalarGridSpec(
            num_scalar_prefetch=0,
            grid=(B, n_t),
            in_specs=in_specs,
            out_specs=[
                pl.BlockSpec((1, C, tile_t), lambda b, j: (b, 0, j)),
                pl.BlockSpec((1, S, tile_t), lambda b, j: (b, 0, j)),
            ],
            scratch_shapes=scratch_shapes),
        # skp is read-modify-write: reuse its buffer for the skp output.
        input_output_aliases={skp_in_idx: 1},
        compiler_params=pltpu.CompilerParams(
            dimension_semantics=dim_sem,
            vmem_limit_bytes=32 * 1024 * 1024),
    )(*inputs)

    return res, skp_out


def residual_block_reference(x, skp, pt_params, *, kernel_size, dilation):
    """Pure-JAX reference mirroring the PyTorch forward (NCL layout)."""
    wd_pt, bd, wr_pt, br, ws_pt, bs = pt_params
    pad = (kernel_size - 1) * dilation
    dn = ('NCH', 'OIH', 'NCH')
    xp = jnp.pad(x, ((0, 0), (0, 0), (pad, 0)))
    y = jax.lax.conv_general_dilated(xp, wd_pt, (1,), 'VALID',
                                     rhs_dilation=(dilation,),
                                     dimension_numbers=dn) + bd[None, :, None]
    C = x.shape[1]
    xa, xb = y[:, :C, :], y[:, C:, :]
    g = jax.nn.sigmoid(xa) * jnp.tanh(xb)
    res = x + (jax.lax.conv_general_dilated(g, wr_pt, (1,), 'VALID',
                                            dimension_numbers=dn) + br[None, :, None])
    skp_out = skp + (jax.lax.conv_general_dilated(g, ws_pt, (1,), 'VALID',
                                                  dimension_numbers=dn) + bs[None, :, None])
    return res, skp_out


if __name__ == "__main__":
    # Small shapes consistent with the module.
    B, res_size, skp_size, T = 2, 4, 8, 16
    kernel_size, dilation = 3, 2

    key = jax.random.PRNGKey(0)
    keys = jax.random.split(key, 10)

    # Deterministic synthetic parameters (PyTorch Conv1d weight layout: (out, in, k)).
    wd_pt = jax.random.normal(keys[0], (2 * res_size, res_size, kernel_size), jnp.float32) * 0.2
    bd = jax.random.normal(keys[1], (2 * res_size,), jnp.float32) * 0.1
    wr_pt = jax.random.normal(keys[2], (res_size, res_size, 1), jnp.float32) * 0.2
    br = jax.random.normal(keys[3], (res_size,), jnp.float32) * 0.1
    ws_pt = jax.random.normal(keys[4], (skp_size, res_size, 1), jnp.float32) * 0.2
    bs = jax.random.normal(keys[5], (skp_size,), jnp.float32) * 0.1

    # Inputs (NCL, as PyTorch).
    x = jax.random.normal(keys[6], (B, res_size, T), jnp.float32)
    skp = jax.random.normal(keys[7], (B, skp_size, T), jnp.float32)

    # Kernel weight layout: per-tap (out, in) matrices; T stays on the lane axis.
    wd = jnp.transpose(wd_pt, (2, 0, 1))          # (K, 2C, C)
    wr = wr_pt[:, :, 0]                           # (C, C)
    ws = ws_pt[:, :, 0]                           # (S, C)
    bd2 = bd.reshape(-1, 1)                       # (2C, 1)
    br2 = br.reshape(-1, 1)
    bs2 = bs.reshape(-1, 1)
    pt_params = (wd_pt, bd, wr_pt, br, ws_pt, bs)
    k_params = (wd, bd2, wr, br2, ws, bs2)

    # ---- single-tile path ("none"): x read exactly once -------------------
    res_r, skp_r = residual_block_reference(x, skp, pt_params,
                                            kernel_size=kernel_size, dilation=dilation)
    jax.block_until_ready((res_r, skp_r))

    res_k, skp_k = residual_block_pallas(x, skp, k_params,
                                         kernel_size=kernel_size, dilation=dilation,
                                         matmul_dtype=jnp.float32)
    jax.block_until_ready((res_k, skp_k))
    np.testing.assert_allclose(np.asarray(res_k), np.asarray(res_r), rtol=1e-5, atol=1e-5)
    np.testing.assert_allclose(np.asarray(skp_k), np.asarray(skp_r), rtol=1e-5, atol=1e-5)

    # ---- multi-tile carry path (B>=2): halo from VMEM carry scratch --------
    T2 = 512
    x2 = jax.random.normal(keys[8], (B, res_size, T2), jnp.float32)
    skp2 = jax.random.normal(keys[9], (B, skp_size, T2), jnp.float32)
    res_r2, skp_r2 = residual_block_reference(x2, skp2, pt_params,
                                              kernel_size=kernel_size, dilation=dilation)
    jax.block_until_ready((res_r2, skp_r2))
    res_k2, skp_k2 = residual_block_pallas(x2, skp2, k_params,
                                           kernel_size=kernel_size, dilation=dilation,
                                           matmul_dtype=jnp.float32, tile_t=128)
    jax.block_until_ready((res_k2, skp_k2))
    np.testing.assert_allclose(np.asarray(res_k2), np.asarray(res_r2), rtol=1e-5, atol=1e-5)
    np.testing.assert_allclose(np.asarray(skp_k2), np.asarray(skp_r2), rtol=1e-5, atol=1e-5)

    # ---- multi-tile prev_tile path (B==1): both grid axes parallel ---------
    x3, skp3 = x2[:1], skp2[:1]
    res_r3, skp_r3 = residual_block_reference(x3, skp3, pt_params,
                                              kernel_size=kernel_size, dilation=dilation)
    jax.block_until_ready((res_r3, skp_r3))
    res_k3, skp_k3 = residual_block_pallas(x3, skp3, k_params,
                                           kernel_size=kernel_size, dilation=dilation,
                                           matmul_dtype=jnp.float32, tile_t=128)
    jax.block_until_ready((res_k3, skp_k3))
    np.testing.assert_allclose(np.asarray(res_k3), np.asarray(res_r3), rtol=1e-5, atol=1e-5)
    np.testing.assert_allclose(np.asarray(skp_k3), np.asarray(skp_r3), rtol=1e-5, atol=1e-5)

    # ---- bf16 MXU-input fast path (v6e/v7x); gate/accumulation stay f32 -----
    res_b, skp_b = residual_block_pallas(x, skp, k_params,
                                         kernel_size=kernel_size, dilation=dilation,
                                         matmul_dtype=jnp.bfloat16)
    jax.block_until_ready((res_b, skp_b))
    np.testing.assert_allclose(np.asarray(res_b), np.asarray(res_r), rtol=5e-2, atol=5e-2)
    np.testing.assert_allclose(np.asarray(skp_b), np.asarray(skp_r), rtol=5e-2, atol=5e-2)

    print("KERNEL_OK")
</pallas_src>

<mosaic_0001>
module attributes {stable_mosaic.version = 11 : i64} {
  func.func @residual_block_kernel(%arg0: i32, %arg1: i32, %arg2: memref<1x4x16xf32, #tpu.memory_space<vmem>>, %arg3: memref<1x8x16xf32, #tpu.memory_space<vmem>>, %arg4: memref<3x8x4xf32, #tpu.memory_space<vmem>>, %arg5: memref<8x1xf32, #tpu.memory_space<vmem>>, %arg6: memref<4x4xf32, #tpu.memory_space<vmem>>, %arg7: memref<4x1xf32, #tpu.memory_space<vmem>>, %arg8: memref<8x4xf32, #tpu.memory_space<vmem>>, %arg9: memref<8x1xf32, #tpu.memory_space<vmem>>, %arg10: memref<1x4x16xf32, #tpu.memory_space<vmem>>, %arg11: memref<1x8x16xf32, #tpu.memory_space<vmem>>) attributes {dimension_semantics = [#tpu.dimension_semantics<parallel>, #tpu.dimension_semantics<parallel>], iteration_bounds = array<i64: 2, 1>, scalar_prefetch = 0 : i64, scratch_operands = 0 : i64, tpu.core_type = #tpu.core_type<tc>, window_params = [{transform_indices = @transform_0, window_bounds = array<i64: 1, 4, 16>}, {transform_indices = @transform_1, window_bounds = array<i64: 1, 8, 16>}, {pipeline_mode = #tpu.pipeline_mode<synchronous>, transform_indices = @transform_2, window_bounds = array<i64: 3, 8, 4>}, {pipeline_mode = #tpu.pipeline_mode<synchronous>, transform_indices = @transform_3, window_bounds = array<i64: 8, 1>}, {pipeline_mode = #tpu.pipeline_mode<synchronous>, transform_indices = @transform_4, window_bounds = array<i64: 4, 4>}, {pipeline_mode = #tpu.pipeline_mode<synchronous>, transform_indices = @transform_5, window_bounds = array<i64: 4, 1>}, {pipeline_mode = #tpu.pipeline_mode<synchronous>, transform_indices = @transform_6, window_bounds = array<i64: 8, 4>}, {pipeline_mode = #tpu.pipeline_mode<synchronous>, transform_indices = @transform_7, window_bounds = array<i64: 8, 1>}, {transform_indices = @transform_8, window_bounds = array<i64: 1, 4, 16>}, {transform_indices = @transform_9, window_bounds = array<i64: 1, 8, 16>}]} {
    %c0 = arith.constant 0 : index
    %c0_0 = arith.constant 0 : index
    %c0_1 = arith.constant 0 : index
    %0 = vector.load %arg2[%c0, %c0_0, %c0_1] : memref<1x4x16xf32, #tpu.memory_space<vmem>>, vector<1x4x16xf32>
    %1 = vector.shape_cast %0 : vector<1x4x16xf32> to vector<4x16xf32>
    %2 = tpu.iota {dimensions = array<i32: 1>} : vector<4x16xi32>
    %cst = arith.constant 0.000000e+00 : f32
    %3 = vector.broadcast %cst : f32 to vector<8x16xf32>
    %c4_i32 = arith.constant 4 : i32
    %4 = tpu.dynamic_rotate %1 by %c4_i32 dim 1 : vector<4x16xf32>, i32 -> vector<4x16xf32>
    %c4_i32_2 = arith.constant 4 : i32
    %5 = vector.broadcast %c4_i32_2 : i32 to vector<4x16xi32>
    %6 = arith.cmpi slt, %2, %5 : vector<4x16xi32>
    %cst_3 = arith.constant 0.000000e+00 : f32
    %7 = vector.broadcast %cst_3 : f32 to vector<4x16xf32>
    %8 = arith.select %6, %7, %4 : vector<4x16xi1>, vector<4x16xf32>
    %c0_4 = arith.constant 0 : index
    %c0_5 = arith.constant 0 : index
    %c0_6 = arith.constant 0 : index
    %9 = vector.load %arg4[%c0_4, %c0_5, %c0_6] : memref<3x8x4xf32, #tpu.memory_space<vmem>>, vector<1x8x4xf32>
    %10 = vector.shape_cast %9 : vector<1x8x4xf32> to vector<8x4xf32>
    %cst_7 = arith.constant dense<0.000000e+00> : vector<8x16xf32>
    %11 = tpu.matmul %10, %8, %cst_7 {dimension_numbers = #tpu.dot_dimension_numbers<[1], [0], [0], [1], [0, 0, 1, 1], [], []>} : vector<8x4xf32>, vector<4x16xf32>, vector<8x16xf32> -> vector<8x16xf32>
    %12 = arith.addf %3, %11 : vector<8x16xf32>
    %c2_i32 = arith.constant 2 : i32
    %13 = tpu.dynamic_rotate %1 by %c2_i32 dim 1 : vector<4x16xf32>, i32 -> vector<4x16xf32>
    %c2_i32_8 = arith.constant 2 : i32
    %14 = vector.broadcast %c2_i32_8 : i32 to vector<4x16xi32>
    %15 = arith.cmpi slt, %2, %14 : vector<4x16xi32>
    %cst_9 = arith.constant 0.000000e+00 : f32
    %16 = vector.broadcast %cst_9 : f32 to vector<4x16xf32>
    %17 = arith.select %15, %16, %13 : vector<4x16xi1>, vector<4x16xf32>
    %c1 = arith.constant 1 : index
    %c0_10 = arith.constant 0 : index
    %c0_11 = arith.constant 0 : index
    %18 = vector.load %arg4[%c1, %c0_10, %c0_11] : memref<3x8x4xf32, #tpu.memory_space<vmem>>, vector<1x8x4xf32>
    %19 = vector.shape_cast %18 : vector<1x8x4xf32> to vector<8x4xf32>
    %cst_12 = arith.constant dense<0.000000e+00> : vector<8x16xf32>
    %20 = tpu.matmul %19, %17, %cst_12 {dimension_numbers = #tpu.dot_dimension_numbers<[1], [0], [0], [1], [0, 0, 1, 1], [], []>} : vector<8x4xf32>, vector<4x16xf32>, vector<8x16xf32> -> vector<8x16xf32>
    %21 = arith.addf %12, %20 : vector<8x16xf32>
    %c2 = arith.constant 2 : index
    %c0_13 = arith.constant 0 : index
    %c0_14 = arith.constant 0 : index
    %22 = vector.load %arg4[%c2, %c0_13, %c0_14] : memref<3x8x4xf32, #tpu.memory_space<vmem>>, vector<1x8x4xf32>
    %23 = vector.shape_cast %22 : vector<1x8x4xf32> to vector<8x4xf32>
    %cst_15 = arith.constant dense<0.000000e+00> : vector<8x16xf32>
    %24 = tpu.matmul %23, %1, %cst_15 {dimension_numbers = #tpu.dot_dimension_numbers<[1], [0], [0], [1], [0, 0, 1, 1], [], []>} : vector<8x4xf32>, vector<4x16xf32>, vector<8x16xf32> -> vector<8x16xf32>
    %25 = arith.addf %21, %24 : vector<8x16xf32>
    %c0_16 = arith.constant 0 : index
    %c0_17 = arith.constant 0 : index
    %26 = vector.load %arg5[%c0_16, %c0_17] : memref<8x1xf32, #tpu.memory_space<vmem>>, vector<8x1xf32>
    %27 = vector.broadcast %26 : vector<8x1xf32> to vector<8x16xf32>
    %28 = arith.addf %25, %27 : vector<8x16xf32>
    %29 = vector.extract_strided_slice %28 {offsets = [0, 0], sizes = [4, 16], strides = [1, 1]} : vector<8x16xf32> to vector<4x16xf32>
    %30 = arith.negf %29 : vector<4x16xf32>
    %31 = math.exp %30 : vector<4x16xf32>
    %cst_18 = arith.constant 1.000000e+00 : f32
    %32 = vector.broadcast %cst_18 : f32 to vector<4x16xf32>
    %33 = arith.addf %32, %31 : vector<4x16xf32>
    %34 = arith.divf %32, %33 : vector<4x16xf32>
    %35 = vector.extract_strided_slice %28 {offsets = [4, 0], sizes = [4, 16], strides = [1, 1]} : vector<8x16xf32> to vector<4x16xf32>
    %36 = math.tanh %35 : vector<4x16xf32>
    %37 = arith.mulf %34, %36 : vector<4x16xf32>
    %c0_19 = arith.constant 0 : index
    %c0_20 = arith.constant 0 : index
    %38 = vector.load %arg6[%c0_19, %c0_20] : memref<4x4xf32, #tpu.memory_space<vmem>>, vector<4x4xf32>
    %cst_21 = arith.constant dense<0.000000e+00> : vector<4x16xf32>
    %39 = tpu.matmul %38, %37, %cst_21 {dimension_numbers = #tpu.dot_dimension_numbers<[1], [0], [0], [1], [0, 0, 1, 1], [], []>} : vector<4x4xf32>, vector<4x16xf32>, vector<4x16xf32> -> vector<4x16xf32>
    %40 = arith.addf %1, %39 : vector<4x16xf32>
    %c0_22 = arith.constant 0 : index
    %c0_23 = arith.constant 0 : index
    %41 = vector.load %arg7[%c0_22, %c0_23] : memref<4x1xf32, #tpu.memory_space<vmem>>, vector<4x1xf32>
    %42 = vector.broadcast %41 : vector<4x1xf32> to vector<4x16xf32>
    %43 = arith.addf %40, %42 : vector<4x16xf32>
    %c0_24 = arith.constant 0 : index
    %c0_25 = arith.constant 0 : index
    %c0_26 = arith.constant 0 : index
    %44 = vector.load %arg3[%c0_24, %c0_25, %c0_26] : memref<1x8x16xf32, #tpu.memory_space<vmem>>, vector<1x8x16xf32>
    %45 = vector.shape_cast %44 : vector<1x8x16xf32> to vector<8x16xf32>
    %c0_27 = arith.constant 0 : index
    %c0_28 = arith.constant 0 : index
    %46 = vector.load %arg8[%c0_27, %c0_28] : memref<8x4xf32, #tpu.memory_space<vmem>>, vector<8x4xf32>
    %cst_29 = arith.constant dense<0.000000e+00> : vector<8x16xf32>
    %47 = tpu.matmul %46, %37, %cst_29 {dimension_numbers = #tpu.dot_dimension_numbers<[1], [0], [0], [1], [0, 0, 1, 1], [], []>} : vector<8x4xf32>, vector<4x16xf32>, vector<8x16xf32> -> vector<8x16xf32>
    %48 = arith.addf %45, %47 : vector<8x16xf32>
    %c0_30 = arith.constant 0 : index
    %c0_31 = arith.constant 0 : index
    %49 = vector.load %arg9[%c0_30, %c0_31] : memref<8x1xf32, #tpu.memory_space<vmem>>, vector<8x1xf32>
    %50 = vector.broadcast %49 : vector<8x1xf32> to vector<8x16xf32>
    %51 = arith.addf %48, %50 : vector<8x16xf32>
    %c0_32 = arith.constant 0 : index
    %c0_33 = arith.constant 0 : index
    %c0_34 = arith.constant 0 : index
    %52 = vector.load %arg10[%c0_32, %c0_33, %c0_34] : memref<1x4x16xf32, #tpu.memory_space<vmem>>, vector<1x4x16xf32>
    %53 = vector.shape_cast %52 : vector<1x4x16xf32> to vector<4x16xf32>
    %54 = vector.shape_cast %43 : vector<4x16xf32> to vector<1x4x16xf32>
    tpu.vector_store %arg10[%c0_32, %c0_33, %c0_34], %54 {strides = array<i32>} : memref<1x4x16xf32, #tpu.memory_space<vmem>>, vector<1x4x16xf32>,
    %c0_35 = arith.constant 0 : index
    %c0_36 = arith.constant 0 : index
    %c0_37 = arith.constant 0 : index
    %55 = vector.load %arg11[%c0_35, %c0_36, %c0_37] : memref<1x8x16xf32, #tpu.memory_space<vmem>>, vector<1x8x16xf32>
    %56 = vector.shape_cast %55 : vector<1x8x16xf32> to vector<8x16xf32>
    %57 = vector.shape_cast %51 : vector<8x16xf32> to vector<1x8x16xf32>
    tpu.vector_store %arg11[%c0_35, %c0_36, %c0_37], %57 {strides = array<i32>} : memref<1x8x16xf32, #tpu.memory_space<vmem>>, vector<1x8x16xf32>,
    return
  }
  func.func @transform_0(%arg0: i32, %arg1: i32) -> (i32, i32, i32) {
    %c0_i32 = arith.constant 0 : i32
    %c0_i32_0 = arith.constant 0 : i32
    return %arg0, %c0_i32, %arg1 : i32, i32, i32
  }
  func.func @transform_1(%arg0: i32, %arg1: i32) -> (i32, i32, i32) {
    %c0_i32 = arith.constant 0 : i32
    %c0_i32_0 = arith.constant 0 : i32
    return %arg0, %c0_i32, %arg1 : i32, i32, i32
  }
  func.func @transform_2(%arg0: i32, %arg1: i32) -> (i32, i32, i32) {
    %c0_i32 = arith.constant 0 : i32
    %c0_i32_0 = arith.constant 0 : i32
    %c0_i32_1 = arith.constant 0 : i32
    %c0_i32_2 = arith.constant 0 : i32
    return %c0_i32, %c0_i32_0, %c0_i32_1 : i32, i32, i32
  }
  func.func @transform_3(%arg0: i32, %arg1: i32) -> (i32, i32) {
    %c0_i32 = arith.constant 0 : i32
    %c0_i32_0 = arith.constant 0 : i32
    %c0_i32_1 = arith.constant 0 : i32
    return %c0_i32, %c0_i32_0 : i32, i32
  }
  func.func @transform_4(%arg0: i32, %arg1: i32) -> (i32, i32) {
    %c0_i32 = arith.constant 0 : i32
    %c0_i32_0 = arith.constant 0 : i32
    %c0_i32_1 = arith.constant 0 : i32
    return %c0_i32, %c0_i32_0 : i32, i32
  }
  func.func @transform_5(%arg0: i32, %arg1: i32) -> (i32, i32) {
    %c0_i32 = arith.constant 0 : i32
    %c0_i32_0 = arith.constant 0 : i32
    %c0_i32_1 = arith.constant 0 : i32
    return %c0_i32, %c0_i32_0 : i32, i32
  }
  func.func @transform_6(%arg0: i32, %arg1: i32) -> (i32, i32) {
    %c0_i32 = arith.constant 0 : i32
    %c0_i32_0 = arith.constant 0 : i32
    %c0_i32_1 = arith.constant 0 : i32
    return %c0_i32, %c0_i32_0 : i32, i32
  }
  func.func @transform_7(%arg0: i32, %arg1: i32) -> (i32, i32) {
    %c0_i32 = arith.constant 0 : i32
    %c0_i32_0 = arith.constant 0 : i32
    %c0_i32_1 = arith.constant 0 : i32
    return %c0_i32, %c0_i32_0 : i32, i32
  }
  func.func @transform_8(%arg0: i32, %arg1: i32) -> (i32, i32, i32) {
    %c0_i32 = arith.constant 0 : i32
    %c0_i32_0 = arith.constant 0 : i32
    return %arg0, %c0_i32, %arg1 : i32, i32, i32
  }
  func.func @transform_9(%arg0: i32, %arg1: i32) -> (i32, i32, i32) {
    %c0_i32 = arith.constant 0 : i32
    %c0_i32_0 = arith.constant 0 : i32
    return %arg0, %c0_i32, %arg1 : i32, i32, i32
  }
}

</mosaic_0001>

<bundles_post_ra>
// kernel: tpu_custom_call.1
= control target key start
LH: loop header
LB: loop body
LE: loop exit
PB: predicated region body
PF: predicated region fallthrough
CT: control target
= control target key end

     0   :  { %s1629_s0 = inlined_call_operand.vmem [shape: f32[2,4,16], index: 0, kind: input, shape index: {}]   ;;  %s1630_s1 = inlined_call_operand.hbm [shape: f32[2,8,16], index: 1, kind: input, shape index: {}, may-alias: {1,9}]   ;;  %s1631_s2 = inlined_call_operand.vmem [shape: f32[3,8,4], index: 2, kind: input, shape index: {}]   ;;  %s1632_s3 = inlined_call_operand.vmem [shape: f32[8,1], index: 3, kind: input, shape index: {}]   ;;  %s1633_s4 = inlined_call_operand.vmem [shape: f32[4,4], index: 4, kind: input, shape index: {}]   ;;  %s1634_s5 = inlined_call_operand.vmem [shape: f32[4,1], index: 5, kind: input, shape index: {}]   ;;  %s1635_s6 = inlined_call_operand.vmem [shape: f32[8,4], index: 6, kind: input, shape index: {}]   ;;  %s1636_s7 = inlined_call_operand.vmem [shape: f32[8,1], index: 7, kind: input, shape index: {}]   ;;  %s1637_s8 = inlined_call_operand.hbm [shape: f32[2,4,16], index: 8, kind: output, shape index: {0}]   ;;  %s1638_s9 = inlined_call_operand.hbm [shape: f32[2,8,16], index: 9, kind: output, shape index: {1}, may-alias: {1,9}]  }
   0x1   :  { %1641 = sst [smem:[#allocation12_spill]] %s1629_s0 }
   0x2   :  { %1642 = sst [smem:[#allocation13_spill]] %s1630_s1 }
   0x3   :  { %15 = vsyncpa [#allocation3], 0 }
   0x4   :  { %17 = vsyncpa [#allocation3 + $0x1], 0 }
   0x5   :  { %18 = vsyncpa [#allocation4], 0 }
   0x6   :  { %20 = vsyncpa [#allocation4 + $0x1], 0 }
   0x7   :  { %21 = vsyncpa [#allocation7], 0 }
   0x8   :  { %23 = vsyncpa [#allocation7 + $0x1], 0  ;;  %s1366_s30 = smov 0   ;;  %s1368_s10 = smov 0  }
   0x9   :  { %s1370_s11 = smov 0   ;;  %s1372_s12 = smov 0  }
   0xa   :  { %s1374_s13 = smov 0   ;;  %s1376_s14 = smov 0  }
   0xb LB: > { %s1015_s15 = sadd.s32 4294967295, %s1305_s14   ;;  %s1016_s16 = sadd.s32 4294967294, %s1305_s14   ;;  %s1305_s14 = sphi %s1376_s14, %s29_s14   ;;  %s1301_s13 = sphi %s1374_s13, %s1661_s13   ;;  %s1297_s12 = sphi %s1372_s12, %s1660_s12   ;;  %s1293_s11 = sphi %s1370_s11, %s1659_s11   ;;  %s1289_s10 = sphi %s1368_s10, %s1658_s10   ;;  %s1285_s30 = sphi %s1366_s30, %s1657_s30  }
   0xc   : > { %s41_s17 = sadd.s32 1, %s1301_s13  ;;  %s78_s18 = sadd.s32 1, %s1293_s11 }
   0xd   : > { %p43_p0 = scmp.ge.s32.totalorder %s41_s17, 2  ;;  %p85_p1 = scmp.ne.s32.totalorder %s1293_s11, %s1289_s10 }
   0xe   : > { %p86_p2 = scmp.eq.s32.totalorder %s1305_s14, 0  ;;  %p91_p3 = scmp.ne.s32.totalorder %s1289_s10, %s1285_s30 }
   0xf   : > { %s1663_s17 = smov (%p43_p0, %s41_s17), 0  ;;  %p92_p5 = scmp.eq.s32.totalorder %s1015_s15, 0 }
  0x10   : > { %1643 = sst [smem:[#allocation11_spill]] %s1663_s17  ;;  %p1407_p4 = por %p86_p2, %p85_p1 }
  0x11   : > { %s73_s20 = ssub.s32 %s1301_s13, %s1663_s17  ;;  %p243_p6 = scmp.eq.s32.totalorder %s1015_s15, 1 }
  0x12   : > { %p76_p7 = scmp.eq.s32.totalorder %s73_s20, 0  ;;  %p1413_p8 = por %p92_p5, %p91_p3 }
  0x13   : > { %p1417_p9 = por %p243_p6, %p85_p1  ;;  %p249_p10 = scmp.eq.s32.totalorder %s1016_s16, 1 }
  0x14   : > { %s1422_s23 = scalar_select %p76_p7, %s1293_s11, %s78_s18  }
  0x15   : > { %s1646_s22 = scalar_select %p1417_p9, 1, 0 }
  0x16   : > { %p1424_p11 = por %p249_p10, %p91_p3  ;;  %p1097_p13 = scmp.lt.s32.totalorder %s1305_s14, 2 }
  0x17   : > { %s325_s25 = sand.u32 1, %s1293_s11   ;;  %s1020_s27 = sshll.u32 %s1301_s13, 7 }
  0x18   : > { %s1647_s24 = scalar_select %p1424_p11, 1, 0 }
  0x19   : > { %s1019_s26 = sshll.u32 %s325_s25, 3  ;;  %s1648_s1 = sld [smem:[#allocation13_spill]] }
  0x1a   : > { %s329_s16 = scalar_lea.vmem [#allocation2], %s1019_s26  ;;  %p1441_p0 = pnand %p1097_p13, %p1407_p4 }
  0x1b   : > { %s337_s18 = sshll.u32 %s329_s16, 4  ;;  %s326_s28 = scalar_lea.sflag [#allocation3], %s325_s25  ;;  %s1437_s18 = int_to_ptr.vmem [resolvable:$true] %s337_s18 }
  0x1c   : > { %p1163_p5 = pneg %p1441_p0 }
  0x1f   : > { %s1435_s15 = scalar_lea.hbm %s1648_s1, %s1020_s27  ;;  %s1166_s19 = scalar_lea.hbm %s1648_s1, 256 }
  0x20   : > { %s1161_s27 = scalar_lea.hbm %s1435_s15, 128  ;;  %p1167_p4 = scmp.lt.u32.totalorder %s1435_s15, %s1648_s1 }
  0x21   : > { %p1162_p3 = scmp.ne.s32.totalorder %s1435_s15, %s1161_s27  ;;  %p1168_p10 = scmp.lt.u32.totalorder %s1166_s19, %s1161_s27 }
  0x22   : > { %p1170_p12 = scmp.lt.u32.totalorder %s1161_s27, %s1435_s15 }
  0x23   : > { %p1164_p6 = pnand %p1163_p5, %p1162_p3  ;;  %p1169_p13 = por %p1168_p10, %p1167_p4 }
  0x25   : > { %p1165_p7 = pneg %p1164_p6  ;;  %p1171_p1 = por %p1170_p12, %p1169_p13 }
  0x27   : > { %p1172_p2 = pnand %p1171_p1, %p1165_p7 }
  0x29   : > { %1175 = shalt.err (!%p1172_p2)
}
  0x2a   : > { %s1176_s25 = scalar_lea.vmem %s1437_s18, 128  ;;  %s1307_s26 = smov [#allocation2]  }
  0x2b   : > { %p1177_p3 = scmp.ne.s32.totalorder %s1437_s18, %s1176_s25  ;;  %s1181_s29 = sshll.u32 %s1307_s26, 4  ;;  %s1182_s29 = int_to_ptr.vmem [resolvable:$false] %s1181_s29 }
  0x2c   : > { %s1183_s17 = scalar_lea.vmem %s1182_s29, 256  ;;  %p1184_p9 = scmp.lt.s32.totalorder %s1437_s18, %s1182_s29 }
  0x2d   : > { %p1179_p6 = pnand %p1177_p3, %p1163_p5  ;;  %p1185_p4 = scmp.lt.s32.totalorder %s1183_s17, %s1176_s25 }
  0x2f   : > { %p1180_p11 = pneg %p1179_p6  ;;  %p1186_p10 = por %p1185_p4, %p1184_p9 }
  0x31   : > { %p1187_p12 = pnand %p1186_p10, %p1180_p11 }
  0x33   : > { %1190 = shalt.err (!%p1187_p12)
}
  0x34   : > { %1089 = dma.hbm_to_vmem [thread:$0]  (!%p1441_p0), %s1435_s15, 128, %s1437_s18, %s326_s28  }
  0x35   : > { %p1650_p1 = scmp.lt.s32.totalorder %s1305_s14, 3  ;;  %p1651_p2 = scmp.ge.s32.totalorder %s1305_s14, 1 }
  0x37   : > { %p343_p5 = pnand %p1651_p2, %p1650_p1 }
  0x38   : > { %s1477_s27 = sand.u32 (!%p343_p5), 1, %s1289_s10  }
  0x39   : > { %346 = sbr.rel (%p343_p5) target bundleno = 927 (0x39f), region = 52  ;;  %s1022_s19 = sshll.u32 (!%p343_p5), %s1477_s27, 3 }
  0x3a   : > { %s349_s16 = scalar_lea.sflag (!%p343_p5), [#allocation3], %s1477_s27  ;;  %s1483_s20 = scalar_lea.vmem (!%p343_p5), [#allocation2], %s1022_s19 }
  0x40   : > { %1272 = dma.done.wait (%p1413_p8), %s349_s16, 128  }
  0x41   : > { %1274 = vsyncadd (%p1413_p8), %s349_s16, 4294967168  ;;  %p399_p9 = scmp.lt.s32.totalorder %s1297_s12, 1  ;;  %s1652_s0 = sld [smem:[#allocation12_spill]]  ;;  %vm409_vm0 = vcmask 1047680   ;;  %v1309_v3 = vmov 0.0   ;;  %vm1310_vm1 = vmmov 0   ;;  %v407_v8 = vlaneseq }
  0x42   : > { %s1308_s29 = smov 16   ;;  %1055 = vmatprep.subr.mxu0 %v1309_v3  ;;  %1060 = vmatprep.subr.mxu1 %v1309_v3  ;;  %v663_v4 = vld [vmem:[%s1632_s3] sm:$0xff]  ;;  %v1311_v5 = vmov 0   ;;  %s1312_s16 = smov 114   ;;  %vm434_vm3 = vcmask 1043456   ;;  %v1026_v11 = vld [vmem:[%s1631_s2 + $0x8] sm:$0xff] }
  0x43   : > { %s400_s15 = scalar_select %p399_p9, %s1297_s12, 1  ;;  %1057 = vmatprep.mubr.msk.f32.mxu0 %vm1310_vm1, %v1309_v3  ;;  %1062 = vmatprep.mubr.msk.f32.mxu1 %vm1310_vm1, %v1309_v3  ;;  %v408_v9 = vand.u32 127, %v407_v8  ;;  %vm430_vm4 = vcmask 31744   ;;  %v422_v14 = vld [vmem:[%s1631_s2] sm:$0xff]  ;;  %v1031_v15 = vld [vmem:[%s1631_s2 + $0x10] sm:$0xff]  ;;  %vm849_vm6 = vcmask 125952  }
  0x44   : > { %1153 = vset.pattern.permute.xlu0 %v1311_v5  ;;  %1154 = vset.pattern.permute.xlu1 %v1311_v5  ;;  %v759_v17 = vld [vmem:[%s1634_s5] sm:$0xf]  ;;  %s1023_s21 = sshll.u32 %s1477_s27, 2  ;;  %s1041_s17 = sshll.u32 %s1297_s12, 6  ;;  %vm851_vm7 = vcmask 130048  }
  0x45   : > { %s1025_s18 = sshll.u32 %s400_s15, 2  ;;  %s1313_s15 = smov 116   ;;  %vm423_vm2 = vcmp.lt.s32.totalorder %v408_v9, 2  ;;  %vm416_vm5 = vcmp.lt.s32.totalorder %v408_v9, 4  ;;  %v842_v18 = vld [vmem:[%s1636_s7] sm:$0xff] }
  0x46   : > { %v681_v36 = vld [vmem:[%s1633_s4] sm:$0xf]  ;;  %s398_s28 = scalar_lea.vmem [#allocation6], %s1022_s19  ;;  %s854_s19 = scalar_lea.sflag [#allocation4], %s1477_s27 }
  0x47   : > { %s405_s26 = scalar_lea.vmem %s1652_s0, %s1025_s18  ;;  %v767_v37 = vld [vmem:[%s1635_s6] sm:$0xff]  ;;  %s1042_s18 = sshll.u32 %s1297_s12, 7 }
  0x48   : > { %v1494_v0 = vld [vmem:[%s405_s26] sm:$0xf]  ;;  %s887_s25 = sshll.u32 %s398_s28, 4  ;;  %s1558_s12 = scalar_lea.hbm %s1638_s9, %s1042_s18  ;;  %s1560_s25 = int_to_ptr.vmem [resolvable:$true] %s887_s25 }
  0x49   : > { %410 = vrot.lane.b32.xlu0 %v1494_v0, %s1308_s29  ;;  %v766_v39 = vld [vmem:[%s1483_s20] sm:$0xff]  ;;  %p1653_p11 = scmp.ne.s32.totalorder %s1646_s22, 0  ;;  %s1314_s26 = smov [#allocation5]  }
  0x4a   : > { %s1195_s20 = sshll.u32 %s1314_s26, 4  ;;  %s1196_s20 = int_to_ptr.vmem [resolvable:$false] %s1195_s20 }
  0x4b   : > { %s1197_s1 = scalar_lea.vmem %s1196_s20, 128 }
  0xbb   : > { %v411_v1 = vpop.permute.xlu0 %410 }
  0xbc   : > { %v412_v2 = vsel %vm409_vm0, %v411_v1, %v1494_v0 }
  0xbd   : > { %413 = vrot.lane.b32.xlu0 %v412_v2, %s1308_s29  ;;  %s1551_s29 = scalar_lea.hbm %s1637_s8, %s1041_s17 }
  0xc1   : > { %666 = vperm.xlu0 %1153, %v663_v4  }
 0x12f   : > { %v414_v6 = vpop.permute.xlu0 %413 }
 0x130   : > { %v415_v7 = vsel %vm409_vm0, %v414_v6, %v1494_v0 }
 0x131   : > { %424 = vrot.lane.b32.xlu1 %v415_v7, %s1312_s16  ;;  %s391_s16 = scalar_lea.vmem [#allocation5], %s1023_s21 }
 0x135   : > { %418 = vrot.lane.b32.xlu1 %v415_v7, %s1313_s15  ;;  %s873_s15 = sshll.u32 %s391_s16, 4  ;;  %s1553_s15 = int_to_ptr.vmem [resolvable:$true] %s873_s15 }
 0x136   : > { %s1191_s17 = scalar_lea.vmem %s1553_s15, 64  ;;  %p1198_p13 = scmp.lt.s32.totalorder %s1553_s15, %s1196_s20 }
 0x137   : > { %p1192_p8 = scmp.ne.s32.totalorder %s1553_s15, %s1191_s17  ;;  %p1199_p3 = scmp.lt.s32.totalorder %s1197_s1, %s1191_s17 }
 0x139   : > { %762 = vperm.xlu1 %1154, %v759_v17   ;;  %p1193_p0 = pnand %p1192_p8, %p1653_p11  ;;  %p1200_p6 = por %p1199_p3, %p1198_p13 }
 0x13b   : > { %p1194_p7 = pneg %p1193_p0 }
 0x13d   : > { %845 = vperm.xlu1 %1154, %v842_v18   ;;  %p1201_p4 = pnand %p1200_p6, %p1194_p7 }
 0x140   : > { %v667_v26 = vpop.permute.xlu0 %666 }
 0x1a3   : > { %v425_v10 = vpop.permute.xlu1 %424 }
 0x1a4   : > { %v427_v12 = vsel %vm423_vm2, 0.0, %v425_v10 }
 0x1a5   : > { %1056 = vmatpush3.msk.msra.mxu0 %vm434_vm3, %v427_v12 }
 0x1a6   : > { %1058 = vmatmul.mubr.msk.f32.vlgmr.msra.gmra.mrb[0].mxu0 %vm430_vm4, %v1026_v11  ;;  %1065 = vmatprep.subr.mxu0 %v1309_v3 }
 0x1a7   : > { %v419_v13 = vpop.permute.xlu1 %418  ;;  %1066 = vmatpush3.msk.msra.mxu0 %vm434_vm3, %v1494_v0  ;;  %1067 = vmatprep.mubr.msk.f32.mxu0 %vm1310_vm1, %v1309_v3 }
 0x1a8   : > { %v421_v16 = vsel %vm416_vm5, 0.0, %v419_v13  ;;  %1075 = vmatprep.subr.mxu0 %v1309_v3 }
 0x1a9   : > { %1061 = vmatpush3.msk.msra.mxu1 %vm434_vm3, %v421_v16 }
 0x1aa   : > { %1063 = vmatmul.mubr.msk.f32.vlgmr.msra.gmra.mrb[0].mxu1 %vm430_vm4, %v422_v14  ;;  %1068 = vmatmul.mubr.msk.f32.vlgmr.msra.gmra.mrb[2].mxu0 %vm430_vm4, %v1031_v15 }
 0x1ab   : > { %1070 = vmatprep.subr.mxu1 %v1309_v3  ;;  %1072 = vmatprep.mubr.msk.f32.mxu1 %vm1310_vm1, %v1309_v3 }
 0x1ac   : > { %1077 = vmatprep.mubr.msk.f32.mxu0 %vm1310_vm1, %v1309_v3 }
 0x1b8   : > { %v763_v38 = vpop.permute.xlu1 %762 }
 0x1bc   : > { %v846_v46 = vpop.permute.xlu1 %845 }
 0x279   : > { %v504_v19 = vpop.f32.mrb[0].mxu0 }
 0x27a   : > { %v1059_v20 = vpop.f32.mrb[1].mxu0 }
 0x27d   : > { %v580_v21 = vpop.f32.mrb[0].mxu1  ;;  %v658_v22 = vpop.f32.mrb[2].mxu0 }
 0x27e   : > { %v581_v23 = vadd.f32 %v580_v21, %v504_v19  ;;  %v1064_v24 = vpop.f32.mrb[1].mxu1  ;;  %v1069_v25 = vpop.f32.mrb[3].mxu0 }
 0x280   : > { %v662_v27 = vadd.f32 %v658_v22, %v581_v23 }
 0x282   : > { %v669_v28 = vadd.f32 %v667_v26, %v662_v27 }
 0x284   : > { %v1034_v29 = vmul.f32 -1.442695, %v669_v28 }
 0x286   : > { %1155 = vpow2.f32 %v1034_v29 }
 0x287   : > { %1157 = vtanh.f32 %v669_v28 }
 0x290   : > { %v1156_v30 = vpop.eup %1155 }
 0x291   : > { %v673_v31 = vadd.f32 1.0, %v1156_v30  ;;  %v1158_v32 = vpop.eup %1157 }
 0x292   : > { %v678_v33 = vrot.slane %v1158_v32, 4 }
 0x293   : > { %1159 = vrcp.f32 %v673_v31 }
 0x29d   : > { %v1160_v34 = vpop.eup %1159 }
 0x29e   : > { %v680_v35 = vmul.f32 %v1160_v34, %v678_v33 }
 0x2a0   : > { %1071 = vmatpush3.msk.msra.mxu1 %vm434_vm3, %v680_v35  ;;  %1076 = vmatpush3.msk.msra.mxu0 %vm434_vm3, %v680_v35 }
 0x2a1   : > { %1073 = vmatmul.mubr.msk.f32.vlgmr.msra.gmra.mrb[2].mxu1 %vm430_vm4, %v681_v36  ;;  %1078 = vmatmul.mubr.msk.f32.vlgmr.msra.gmra.mrb[4].mxu0 %vm430_vm4, %v767_v37 }
 0x374   : > { %v754_v40 = vpop.f32.mrb[2].mxu1  ;;  %v837_v41 = vpop.f32.mrb[4].mxu0 }
 0x375   : > { %v758_v42 = vadd.f32 %v754_v40, %v1494_v0  ;;  %v841_v43 = vadd.f32 %v837_v41, %v766_v39  ;;  %v1074_v44 = vpop.f32.mrb[3].mxu1  ;;  %v1079_v45 = vpop.f32.mrb[5].mxu0 }
 0x377   : > { %v765_v47 = vadd.f32 %v763_v38, %v758_v42  ;;  %v848_v48 = vadd.f32 %v846_v46, %v841_v43 }
 0x379   : > { %850 = vst.msk [vmem:[%s391_s16] sm:$0xf] %vm849_vm6, %v765_v47 }
 0x37a   : > { %852 = vst.msk [vmem:[%s398_s28] sm:$0xff] %vm851_vm7, %v848_v48 }
 0x37b   : > { %1204 = shalt.err (!%p1201_p4)
}
 0x37c   : > { %s1205_s0 = scalar_lea.hbm %s1551_s29, 64  ;;  %s1209_s28 = scalar_lea.hbm %s1637_s8, 128 }
 0x37d   : > { %p1206_p10 = scmp.ne.s32.totalorder %s1551_s29, %s1205_s0  ;;  %p1210_p2 = scmp.lt.u32.totalorder %s1551_s29, %s1637_s8 }
 0x37e   : > { %p1211_p5 = scmp.lt.u32.totalorder %s1209_s28, %s1205_s0  ;;  %p1213_p8 = scmp.lt.u32.totalorder %s1205_s0, %s1551_s29 }
 0x37f   : > { %p1207_p12 = pnand %p1206_p10, %p1653_p11 }
 0x380   : > { %p1212_p9 = por %p1211_p5, %p1210_p2 }
 0x381   : > { %p1208_p1 = pneg %p1207_p12 }
 0x382   : > { %p1214_p0 = por %p1213_p8, %p1212_p9 }
 0x384   : > { %p1215_p7 = pnand %p1214_p0, %p1208_p1 }
 0x386   : > { %1218 = shalt.err (!%p1215_p7)
}
 0x387   : > { %1082 = dma.vmem_to_hbm [thread:$0]  (%p1653_p11), %s1553_s15, 64, %s1551_s29, %s854_s19  }
 0x388   : > { %s859_s1 = scalar_lea.sflag [#allocation7], %s1477_s27  ;;  %s1219_s17 = scalar_lea.vmem %s1560_s25, 128 }
 0x389   : > { %p1220_p13 = scmp.ne.s32.totalorder %s1560_s25, %s1219_s17  ;;  %s1315_s20 = smov [#allocation6]  }
 0x38a   : > { %s1223_s0 = sshll.u32 %s1315_s20, 4  ;;  %s1224_s0 = int_to_ptr.vmem [resolvable:$false] %s1223_s0 }
 0x38b   : > { %p1221_p3 = pnand %p1220_p13, %p1653_p11  ;;  %s1225_s16 = scalar_lea.vmem %s1224_s0, 256 }
 0x38c   : > { %p1226_p4 = scmp.lt.s32.totalorder %s1560_s25, %s1224_s0  ;;  %p1227_p10 = scmp.lt.s32.totalorder %s1225_s16, %s1219_s17 }
 0x38d   : > { %p1222_p6 = pneg %p1221_p3 }
 0x38e   : > { %p1228_p12 = por %p1227_p10, %p1226_p4 }
 0x390   : > { %p1229_p1 = pnand %p1228_p12, %p1222_p6 }
 0x392   : > { %1232 = shalt.err (!%p1229_p1)
}
 0x393   : > { %s1233_s27 = scalar_lea.hbm %s1558_s12, 128  ;;  %s1237_s19 = scalar_lea.hbm %s1638_s9, 256 }
 0x394   : > { %p1234_p2 = scmp.ne.s32.totalorder %s1558_s12, %s1233_s27  ;;  %p1238_p8 = scmp.lt.u32.totalorder %s1558_s12, %s1638_s9 }
 0x395   : > { %p1239_p0 = scmp.lt.u32.totalorder %s1237_s19, %s1233_s27  ;;  %p1241_p13 = scmp.lt.u32.totalorder %s1233_s27, %s1558_s12 }
 0x396   : > { %p1235_p5 = pnand %p1234_p2, %p1653_p11 }
 0x397   : > { %p1240_p7 = por %p1239_p0, %p1238_p8 }
 0x398   : > { %p1236_p9 = pneg %p1235_p5 }
 0x399   : > { %p1242_p3 = por %p1241_p13, %p1240_p7 }
 0x39b   : > { %p1243_p6 = pnand %p1242_p3, %p1236_p9 }
 0x39d   : > { %1246 = shalt.err (!%p1243_p6)
}
 0x39e   : > { %1083 = dma.vmem_to_hbm [thread:$0]  (%p1653_p11), %s1560_s25, 128, %s1558_s12, %s859_s1  }
 0x39f PF: > { %s899_s21 = sand.u32 1, %s1285_s30   ;;  %p1654_p4 = scmp.ne.s32.totalorder %s1647_s24, 0 }
 0x3a0   : > { %p1655_p10 = scmp.ge.s32.totalorder %s1305_s14, 2  ;;  %s900_s26 = scalar_lea.sflag [#allocation4], %s899_s21 }
 0x3a2   : > { %p1091_p12 = pnand %p1655_p10, %p1654_p4 }
 0x3a4   : > { %1276 = dma.done.wait (!%p1091_p12), %s900_s26, 64  }
 0x3a5   : > { %1278 = vsyncadd (!%p1091_p12), %s900_s26, 4294967232  ;;  %s909_s17 = scalar_lea.sflag [#allocation7], %s899_s21 }
 0x3a6   : > { %1280 = dma.done.wait (!%p1091_p12), %s909_s17, 128  }
 0x3a7   : > { %1282 = vsyncadd (!%p1091_p12), %s909_s17, 4294967168  ;;  %s29_s14 = sadd.s32 1, %s1305_s14   ;;  %s1656_s22 = sld [smem:[#allocation11_spill]] }
 0x3a8   : > { %p26_p1 = scmp.ge.s32.totalorder %s29_s14, 4   ;;  %s1657_s30 = smov %s1289_s10 }
 0x3a9   : > { %s1658_s10 = smov %s1293_s11  ;;  %s1659_s11 = smov %s1422_s23 }
 0x3aa   : > { %s1660_s12 = smov %s1301_s13  ;;  %28 = sbr.rel (!%p26_p1) target bundleno = 11 (0xb), region = 119 }
 0x3ad   : > { %s1661_s13 = smov %s1656_s22 }
 0x3b1   :  { %914 = vsyncpa [#allocation3], 1 }
 0x3b2   :  { %916 = vsyncpa [#allocation3 + $0x1], 1 }
 0x3b3   :  { %917 = vsyncpa [#allocation4], 1 }
 0x3b4   :  { %919 = vsyncpa [#allocation4 + $0x1], 1 }
 0x3b5   :  { %920 = vsyncpa [#allocation7], 1 }
 0x3b6   :  { %922 = vsyncpa [#allocation7 + $0x1], 1 }

</bundles_post_ra>
